<compile_context>
chip_gen: v7x
topology: tpu7x:2x2x1
jax: 0.10.0
libtpu: 0.0.40
codegen_flags: <defaults>
</compile_context>

<pallas_src>
import jax
import jax.numpy as jnp
from jax.experimental import pallas as pl
from jax.experimental.pallas import tpu as pltpu


def _round_up(a: int, b: int) -> int:
    return ((a + b - 1) // b) * b


# -----------------------------------------------------------------------------
# Primary path: zero-copy identity (output buffer aliased to x, no DMA issued).
# -----------------------------------------------------------------------------
def _hard_identity_kernel(x_hbm_ref, o_hbm_ref, flag_ref):
    # The output buffer is aliased to the input buffer (input_output_aliases),
    # so the pass-through requires no data movement.  Write one SMEM scalar so
    # the kernel body is non-empty for lowering.
    del x_hbm_ref, o_hbm_ref
    flag_ref[0] = jnp.int32(1)


def hard_forward(mask: jax.Array, x: jax.Array) -> jax.Array:
    """Pallas equivalent of Hard.forward((mask, x)) -> x  (zero-copy)."""
    del mask  # unused by the reference forward; never shipped to the kernel
    return pl.pallas_call(
        _hard_identity_kernel,
        out_shape=jax.ShapeDtypeStruct(x.shape, x.dtype),
        in_specs=[pl.BlockSpec(memory_space=pl.ANY)],   # leave x in HBM, no auto-DMA
        out_specs=pl.BlockSpec(memory_space=pl.ANY),
        scratch_shapes=[pltpu.SMEM((1,), jnp.int32)],
        input_output_aliases={0: 0},                    # output IS the x buffer
    )(x)


# -----------------------------------------------------------------------------
# Secondary path: explicit lane-dense copy (only if a fresh buffer is required).
# -----------------------------------------------------------------------------
def _hard_copy_kernel(x_ref, o_ref):
    o_ref[...] = x_ref[...]


def hard_forward_copy(mask: jax.Array, x: jax.Array, *,
                      lanes: int = 512, max_block_rows: int = 1024) -> jax.Array:
    """Materialized copy of x, tiled lane-dense (rows, 512) with ~2 MiB blocks."""
    del mask
    total = x.size
    rows = pl.cdiv(total, lanes)
    block_rows = min(max_block_rows, _round_up(rows, 8))   # multiple of 8 sublanes
    rows_p = _round_up(rows, block_rows)

    flat = x.reshape(-1)
    pad = rows_p * lanes - total
    if pad:
        flat = jnp.pad(flat, (0, pad))
    x2 = flat.reshape(rows_p, lanes)

    out2 = pl.pallas_call(
        _hard_copy_kernel,
        out_shape=jax.ShapeDtypeStruct((rows_p, lanes), x.dtype),
        grid=(rows_p // block_rows,),
        in_specs=[pl.BlockSpec((block_rows, lanes), lambda i: (i, 0))],
        out_specs=pl.BlockSpec((block_rows, lanes), lambda i: (i, 0)),
        compiler_params=pltpu.CompilerParams(
            dimension_semantics=("parallel",),   # shards the copy across TCs on v7x
        ),
    )(x2)
    return out2.reshape(-1)[:total].reshape(x.shape)


# TODO(synk): Hard.checkmask() is never invoked by forward(); it is not part of
# the forward-pass semantics and is intentionally not lowered here.


if __name__ == "__main__":
    key = jax.random.PRNGKey(0)
    k_mask, k_x = jax.random.split(key)

    N, C, H, W = 2, 4, 16, 16
    mask = (jax.random.uniform(k_mask, (N, C, H, W)) > 0.5).astype(jnp.float32)
    x = jax.random.normal(k_x, (N, C, H, W), dtype=jnp.float32)

    # Zero-copy aliased path (primary).
    out = hard_forward(mask, x)
    jax.block_until_ready(out)
    assert out.shape == x.shape and out.dtype == x.dtype
    assert bool(jnp.all(out == x))

    # Lane-dense explicit-copy path (secondary).
    out_copy = hard_forward_copy(mask, x)
    jax.block_until_ready(out_copy)
    assert out_copy.shape == x.shape and out_copy.dtype == x.dtype
    assert bool(jnp.all(out_copy == x))

    print("KERNEL_OK")
</pallas_src>

<mosaic_0001>
module attributes {stable_mosaic.version = 11 : i64} {
  func.func @_hard_identity_kernel(%arg0: memref<2x4x16x16xf32, #tpu.memory_space<any>>, %arg1: memref<2x4x16x16xf32, #tpu.memory_space<any>>, %arg2: memref<1xi32, #tpu.memory_space<smem>>) attributes {dimension_semantics = [], scalar_prefetch = 0 : i64, scratch_operands = 1 : i64, tpu.core_type = #tpu.core_type<tc>} {
    %c1_i32 = arith.constant 1 : i32
    %c0 = arith.constant 0 : index
    %0 = memref.load %arg2[%c0] : memref<1xi32, #tpu.memory_space<smem>>
    memref.store %c1_i32, %arg2[%c0] : memref<1xi32, #tpu.memory_space<smem>>
    return
  }
}

</mosaic_0001>

<bundles_post_ra>
// kernel: tpu_custom_call.1
= control target key start
LH: loop header
LB: loop body
LE: loop exit
PB: predicated region body
PF: predicated region fallthrough
CT: control target
= control target key end

     0   :  { %s18_s0 = inlined_call_operand.hbm [shape: f32[2,4,16,16], index: 0, kind: input, shape index: {}, may-alias: {0,1}]   ;;  %s19_s1 = inlined_call_operand.hbm [shape: f32[2,4,16,16], index: 1, kind: output, shape index: {}, may-alias: {0,1}]  }

</bundles_post_ra>
